<compile_context>
chip_gen: v7x
topology: tpu7x:2x2x1
jax: 0.10.0
libtpu: 0.0.40
codegen_flags: <defaults>
</compile_context>

<pallas_src>
import math

import jax
import jax.numpy as jnp
from jax import lax
from jax.experimental import pallas as pl
from jax.experimental.pallas import tpu as pltpu

# ---------------- synthetic config (small) ----------------
BATCH = 2
SEQ = 8
HIDDEN = 64
N_HEAD = 4
HEAD_DIM = HIDDEN // N_HEAD          # 16
NUM_KV_HEADS = 2
KV_PROJ = HEAD_DIM * NUM_KV_HEADS    # 32  -> key_value proj width = 2 * KV_PROJ
N_REP = N_HEAD // NUM_KV_HEADS
FFN = 128
EPS = 1e-6
ROPE_BASE = 10000.0
TRAINING_SEQLEN = 8
BASE_SEQLEN = 8


# ---------------- rotary embedding (TeleChat2RotaryEmbedding.forward) ----------------
def rotary_cos_sin(seq_len, dim):
    s = max(seq_len, TRAINING_SEQLEN)
    context_value = math.log(s / BASE_SEQLEN, 2) + 1
    ntk_alpha = max(2 ** math.ceil(context_value) - 1, 1)
    scale = s / TRAINING_SEQLEN
    mscale = 1.0 if scale <= 1 else 0.1 * math.log(scale) + 1.0
    base = ROPE_BASE * ntk_alpha ** (dim / (dim - 2))
    inv_freq = 1.0 / (base ** (jnp.arange(0, dim, 2, dtype=jnp.float32) / dim))
    t = jnp.arange(s, dtype=jnp.float32)
    freqs = jnp.einsum("i,j->ij", t, inv_freq)
    emb = jnp.concatenate([freqs, freqs], axis=-1)
    cos = (mscale * jnp.cos(emb))[:seq_len]
    sin = (mscale * jnp.sin(emb))[:seq_len]
    return cos.astype(jnp.float32), sin.astype(jnp.float32)


# ---------------- Pallas kernel (single step, whole layer) ----------------
def decoder_layer_kernel(x_ref, mask_ref, cos2_ref, sin2_ref,
                         ln1w_ref, wqkv_ref, wd_ref, bd_ref,
                         ln2w_ref, wgu_ref, wdown_ref, bdown_ref,
                         out_ref):
    D = HEAD_DIM
    bf16 = jnp.bfloat16
    f32 = jnp.float32

    x = x_ref[...]              # (B*S, H) f32  (batch folded into rows)
    mask = mask_ref[...]        # (B*S, B*S) block-diagonal additive causal mask
    cos2 = cos2_ref[...]        # (B*S, 2*D)  cos tiled over batch rows and [q|k] columns
    sin2 = sin2_ref[...]        # (B*S, 2*D)

    def rmsnorm(v, w):
        var = jnp.mean(v * v, axis=-1, keepdims=True)
        return (v * lax.rsqrt(var + EPS)) * w

    # ---------------- attention block ----------------
    ln1 = rmsnorm(x, ln1w_ref[...])

    # fused projection: one (B*S, H) x (H, 5*N_HEAD*D) bf16 MXU matmul.
    # Per-head column block = [q | k | rot(q) | rot(k) | v]; GQA repeat, rotate_half and
    # the 1/sqrt(D) query scaling are already baked into the weight columns.
    qkv = jnp.dot(ln1.astype(bf16), wqkv_ref[...],
                  preferred_element_type=f32)                       # (B*S, 5*N_HEAD*D)

    stacked = jnp.stack(
        [qkv[:, h * 5 * D:(h + 1) * 5 * D] for h in range(N_HEAD)], axis=0)  # (N_HEAD, B*S, 5*D)

    lin = stacked[..., :2 * D]          # [q | k] linear part
    rot = stacked[..., 2 * D:4 * D]     # [rotate_half(q) | rotate_half(k)] (via weights)
    v3 = stacked[..., 4 * D:]           # (N_HEAD, B*S, D)

    # RoPE: pure elementwise (no roll / slice / concat in-kernel)
    qk = lin * cos2[None] + rot * sin2[None]
    q3 = qk[..., :D]                    # (N_HEAD, B*S, D), already scaled by 1/sqrt(D)
    k3 = qk[..., D:]

    # attention batched over heads; batch separation enforced by block-diagonal mask
    scores = jnp.einsum("hqd,hkd->hqk", q3.astype(bf16), k3.astype(bf16),
                        preferred_element_type=f32)                 # (N_HEAD, B*S, B*S)
    scores = scores + mask[None]
    scores = scores - jnp.max(scores, axis=-1, keepdims=True)
    p = jnp.exp(scores)
    p = p * pl.reciprocal(jnp.sum(p, axis=-1, keepdims=True), approx=True)
    ctx = jnp.einsum("hqk,hkd->hqd", p.astype(bf16), v3.astype(bf16),
                     preferred_element_type=f32)                    # (N_HEAD, B*S, D)

    # flatten heads back to lanes, single flat output projection + bias
    ctx_flat = jnp.concatenate([ctx[h] for h in range(N_HEAD)], axis=-1)   # (B*S, H)
    attn = jnp.dot(ctx_flat.astype(bf16), wd_ref[...],
                   preferred_element_type=f32) + bd_ref[...]
    h_res = x + attn                    # dropout_add with p = 0 (eval)

    # ---------------- MLP block ----------------
    ln2 = rmsnorm(h_res, ln2w_ref[...])
    gu = jnp.dot(ln2.astype(bf16), wgu_ref[...],
                 preferred_element_type=f32)                        # (B*S, 2*FFN)
    g = gu[:, :FFN]
    u = gu[:, FFN:]
    sig = pl.reciprocal(1.0 + jnp.exp(-g), approx=True)             # sigmoid via EUP recip
    act = (g * sig) * u
    mlp = jnp.dot(act.astype(bf16), wdown_ref[...],
                  preferred_element_type=f32) + bdown_ref[...]

    out_ref[...] = h_res + mlp          # dropout_add with p = 0 (eval)


def telechat2_decoder_layer(x, mask, cos, sin, params):
    B, S, H = x.shape
    D = HEAD_DIM
    bf16 = jnp.bfloat16
    scale = 1.0 / math.sqrt(D)

    # ---- fused QKV weight: per head [Wq | Wk | rot(Wq) | rot(Wk) | Wv]  (constant-folded under jit)
    def rot_cols(w):  # rotate_half as a column permutation/negation of the weight
        return jnp.concatenate([-w[:, D // 2:], w[:, :D // 2]], axis=1)

    head_blocks = []
    for h in range(N_HEAD):
        g = h // N_REP                                   # GQA repeat baked in
        wq_h = params["wq"][:, h * D:(h + 1) * D] * scale   # fold 1/sqrt(D) into Q columns
        wk_h = params["wkv"][:, g * 2 * D: g * 2 * D + D]
        wv_h = params["wkv"][:, g * 2 * D + D: (g + 1) * 2 * D]
        head_blocks.append(jnp.concatenate(
            [wq_h, wk_h, rot_cols(wq_h), rot_cols(wk_h), wv_h], axis=1))
    wqkv = jnp.concatenate(head_blocks, axis=1).astype(bf16)        # (H, 5*N_HEAD*D) = (64, 320)

    wd = params["wd"].astype(bf16)                                   # (H, H)
    wgu = jnp.concatenate([params["wg"], params["wu"]], axis=1).astype(bf16)   # (H, 2*FFN)
    wdown = params["wdown"].astype(bf16)                             # (FFN, H)

    # cos/sin tiled over batch rows and over the [q|k] column pair
    cos2 = jnp.tile(cos, (B, 2))                                     # (B*S, 2*D)
    sin2 = jnp.tile(sin, (B, 2))

    # block-diagonal additive mask: within-batch = user causal mask, cross-batch = -1e30
    blocks_mask = mask[:, 0]                                         # (B, S, S)
    same_batch = jnp.eye(B, dtype=bool)[:, None, :, None]            # (B,1,B,1)
    mask_bd = jnp.where(same_batch, blocks_mask[:, :, None, :],
                        jnp.float32(-1e30)).reshape(B * S, B * S)

    x2d = x.reshape(B * S, H)

    vmem = pl.BlockSpec(memory_space=pltpu.MemorySpace.VMEM)
    out2d = pl.pallas_call(
        decoder_layer_kernel,
        out_shape=jax.ShapeDtypeStruct((B * S, H), jnp.float32),
        in_specs=[vmem] * 12,
        out_specs=vmem,
    )(x2d, mask_bd, cos2, sin2,
      params["ln1_w"], wqkv, wd, params["bd"],
      params["ln2_w"], wgu, wdown, params["bdown"])
    return out2d.reshape(B, S, H)


# ---------------- pure-JAX f32 reference (for correctness check) ----------------
def reference(x, mask, cos, sin, p):
    B, S, H = x.shape

    def rmsnorm(v, w):
        var = jnp.mean(v * v, axis=-1, keepdims=True)
        return (v * lax.rsqrt(var + EPS)) * w

    ln1 = rmsnorm(x, p["ln1_w"][0])
    q = ln1 @ p["wq"]
    kv = ln1 @ p["wkv"]
    q = q.reshape(B, S, N_HEAD, HEAD_DIM).transpose(0, 2, 1, 3)
    kv = kv.reshape(B, S, NUM_KV_HEADS, 2 * HEAD_DIM)
    k = kv[..., :HEAD_DIM].transpose(0, 2, 1, 3)
    v = kv[..., HEAD_DIM:].transpose(0, 2, 1, 3)

    def rot_half(t):
        return jnp.concatenate([-t[..., HEAD_DIM // 2:], t[..., :HEAD_DIM // 2]], -1)

    q = q * cos + rot_half(q) * sin
    k = k * cos + rot_half(k) * sin
    k = jnp.repeat(k, N_REP, axis=1)
    v = jnp.repeat(v, N_REP, axis=1)
    scores = jnp.einsum("bhqd,bhkd->bhqk", q, k) / math.sqrt(HEAD_DIM) + mask
    probs = jax.nn.softmax(scores, axis=-1)
    ctx = jnp.einsum("bhqk,bhkd->bhqd", probs, v).transpose(0, 2, 1, 3).reshape(B, S, H)
    attn = ctx @ p["wd"] + p["bd"][0]
    h = x + attn
    ln2 = rmsnorm(h, p["ln2_w"][0])
    g = ln2 @ p["wg"]
    u = ln2 @ p["wu"]
    mlp = (jax.nn.silu(g) * u) @ p["wdown"] + p["bdown"][0]
    return h + mlp


if __name__ == "__main__":
    key = jax.random.PRNGKey(0)
    ks = jax.random.split(key, 10)

    x = jax.random.normal(ks[0], (BATCH, SEQ, HIDDEN), jnp.float32)
    neg = jnp.finfo(jnp.float32).min
    causal = jnp.where(jnp.tril(jnp.ones((SEQ, SEQ), dtype=bool)), 0.0, neg)
    mask = jnp.broadcast_to(causal, (BATCH, 1, SEQ, SEQ)).astype(jnp.float32)
    cos, sin = rotary_cos_sin(SEQ, HEAD_DIM)

    def init(k, shape):
        return 0.02 * jax.random.normal(k, shape, jnp.float32)

    params = {
        "ln1_w": jnp.ones((1, HIDDEN), jnp.float32),
        "ln2_w": jnp.ones((1, HIDDEN), jnp.float32),
        "wq": init(ks[1], (HIDDEN, HIDDEN)),
        "wkv": init(ks[2], (HIDDEN, 2 * KV_PROJ)),
        "wd": init(ks[3], (HIDDEN, HIDDEN)),
        "bd": init(ks[4], (1, HIDDEN)),
        "wg": init(ks[5], (HIDDEN, FFN)),
        "wu": init(ks[6], (HIDDEN, FFN)),
        "wdown": init(ks[7], (FFN, HIDDEN)),
        "bdown": init(ks[8], (1, HIDDEN)),
    }

    layer = jax.jit(telechat2_decoder_layer)
    out = layer(x, mask, cos, sin, params)
    out = jax.block_until_ready(out)

    ref = reference(x, mask, cos, sin, params)
    assert out.shape == (BATCH, SEQ, HIDDEN)
    max_err = float(jnp.max(jnp.abs(out - ref)))
    # kernel uses bf16 MXU operands (f32 accumulation); reference is pure f32
    assert jnp.allclose(out, ref, atol=1e-2, rtol=1e-2), f"max_err={max_err}"
    # TODO(synk): dropout (attention_dropout / hidden_dropout), KV-cache / use_cache and
    # output_attentions paths are identity / omitted in this eval-mode synthetic kernel.
    print("KERNEL_OK")
</pallas_src>

<mosaic_0001>
module attributes {stable_mosaic.version = 11 : i64} {
  func.func @decoder_layer_kernel(%arg0: memref<16x64xf32, #tpu.memory_space<vmem>>, %arg1: memref<16x16xf32, #tpu.memory_space<vmem>>, %arg2: memref<16x32xf32, #tpu.memory_space<vmem>>, %arg3: memref<16x32xf32, #tpu.memory_space<vmem>>, %arg4: memref<1x64xf32, #tpu.memory_space<vmem>>, %arg5: memref<64x320xbf16, #tpu.memory_space<vmem>>, %arg6: memref<64x64xbf16, #tpu.memory_space<vmem>>, %arg7: memref<1x64xf32, #tpu.memory_space<vmem>>, %arg8: memref<1x64xf32, #tpu.memory_space<vmem>>, %arg9: memref<64x256xbf16, #tpu.memory_space<vmem>>, %arg10: memref<128x64xbf16, #tpu.memory_space<vmem>>, %arg11: memref<1x64xf32, #tpu.memory_space<vmem>>, %arg12: memref<16x64xf32, #tpu.memory_space<vmem>>) attributes {dimension_semantics = [], scalar_prefetch = 0 : i64, scratch_operands = 0 : i64, tpu.core_type = #tpu.core_type<tc>} {
    %c0 = arith.constant 0 : index
    %c0_0 = arith.constant 0 : index
    %0 = vector.load %arg0[%c0, %c0_0] : memref<16x64xf32, #tpu.memory_space<vmem>>, vector<16x64xf32>
    %c0_1 = arith.constant 0 : index
    %c0_2 = arith.constant 0 : index
    %1 = vector.load %arg1[%c0_1, %c0_2] : memref<16x16xf32, #tpu.memory_space<vmem>>, vector<16x16xf32>
    %c0_3 = arith.constant 0 : index
    %c0_4 = arith.constant 0 : index
    %2 = vector.load %arg2[%c0_3, %c0_4] : memref<16x32xf32, #tpu.memory_space<vmem>>, vector<16x32xf32>
    %c0_5 = arith.constant 0 : index
    %c0_6 = arith.constant 0 : index
    %3 = vector.load %arg3[%c0_5, %c0_6] : memref<16x32xf32, #tpu.memory_space<vmem>>, vector<16x32xf32>
    %c0_7 = arith.constant 0 : index
    %c0_8 = arith.constant 0 : index
    %4 = vector.load %arg4[%c0_7, %c0_8] : memref<1x64xf32, #tpu.memory_space<vmem>>, vector<1x64xf32>
    %5 = arith.mulf %0, %0 : vector<16x64xf32>
    %cst = arith.constant dense<0.000000e+00> : vector<16xf32>
    %6 = vector.multi_reduction <add>, %5, %cst [1] : vector<16x64xf32> to vector<16xf32>
    %7 = vector.shape_cast %6 : vector<16xf32> to vector<16x1xf32>
    %cst_9 = arith.constant 6.400000e+01 : f32
    %8 = vector.broadcast %cst_9 : f32 to vector<16x1xf32>
    %9 = arith.divf %7, %8 : vector<16x1xf32>
    %cst_10 = arith.constant 9.99999997E-7 : f32
    %10 = vector.broadcast %cst_10 : f32 to vector<16x1xf32>
    %11 = arith.addf %9, %10 : vector<16x1xf32>
    %12 = math.rsqrt %11 : vector<16x1xf32>
    %13 = vector.broadcast %12 : vector<16x1xf32> to vector<16x64xf32>
    %14 = arith.mulf %0, %13 : vector<16x64xf32>
    %15 = vector.broadcast %4 : vector<1x64xf32> to vector<16x64xf32>
    %16 = arith.mulf %14, %15 : vector<16x64xf32>
    %17 = arith.truncf %16 : vector<16x64xf32> to vector<16x64xbf16>
    %c0_11 = arith.constant 0 : index
    %c0_12 = arith.constant 0 : index
    %18 = vector.load %arg5[%c0_11, %c0_12] : memref<64x320xbf16, #tpu.memory_space<vmem>>, vector<64x320xbf16>
    %cst_13 = arith.constant dense<0.000000e+00> : vector<16x320xf32>
    %19 = tpu.matmul %17, %18, %cst_13 {dimension_numbers = #tpu.dot_dimension_numbers<[1], [0], [0], [1], [0, 0, 1, 1], [], []>} : vector<16x64xbf16>, vector<64x320xbf16>, vector<16x320xf32> -> vector<16x320xf32>
    %20 = vector.extract_strided_slice %19 {offsets = [0, 0], sizes = [16, 80], strides = [1, 1]} : vector<16x320xf32> to vector<16x80xf32>
    %21 = vector.extract_strided_slice %19 {offsets = [0, 80], sizes = [16, 80], strides = [1, 1]} : vector<16x320xf32> to vector<16x80xf32>
    %22 = vector.extract_strided_slice %19 {offsets = [0, 160], sizes = [16, 80], strides = [1, 1]} : vector<16x320xf32> to vector<16x80xf32>
    %23 = vector.extract_strided_slice %19 {offsets = [0, 240], sizes = [16, 80], strides = [1, 1]} : vector<16x320xf32> to vector<16x80xf32>
    %24 = vector.shape_cast %20 : vector<16x80xf32> to vector<1x16x80xf32>
    %25 = vector.shape_cast %21 : vector<16x80xf32> to vector<1x16x80xf32>
    %26 = vector.shape_cast %22 : vector<16x80xf32> to vector<1x16x80xf32>
    %27 = vector.shape_cast %23 : vector<16x80xf32> to vector<1x16x80xf32>
    %28 = tpu.concatenate %24, %25, %26, %27 in 0 : vector<1x16x80xf32>, vector<1x16x80xf32>, vector<1x16x80xf32>, vector<1x16x80xf32> -> vector<4x16x80xf32>
    %29 = vector.extract_strided_slice %28 {offsets = [0, 0, 0], sizes = [4, 16, 32], strides = [1, 1, 1]} : vector<4x16x80xf32> to vector<4x16x32xf32>
    %30 = vector.extract_strided_slice %28 {offsets = [0, 0, 32], sizes = [4, 16, 32], strides = [1, 1, 1]} : vector<4x16x80xf32> to vector<4x16x32xf32>
    %31 = vector.extract_strided_slice %28 {offsets = [0, 0, 64], sizes = [4, 16, 16], strides = [1, 1, 1]} : vector<4x16x80xf32> to vector<4x16x16xf32>
    %32 = vector.shape_cast %2 : vector<16x32xf32> to vector<1x16x32xf32>
    %33 = vector.broadcast %32 : vector<1x16x32xf32> to vector<4x16x32xf32>
    %34 = arith.mulf %29, %33 : vector<4x16x32xf32>
    %35 = vector.shape_cast %3 : vector<16x32xf32> to vector<1x16x32xf32>
    %36 = vector.broadcast %35 : vector<1x16x32xf32> to vector<4x16x32xf32>
    %37 = arith.mulf %30, %36 : vector<4x16x32xf32>
    %38 = arith.addf %34, %37 : vector<4x16x32xf32>
    %39 = vector.extract_strided_slice %38 {offsets = [0, 0, 0], sizes = [4, 16, 16], strides = [1, 1, 1]} : vector<4x16x32xf32> to vector<4x16x16xf32>
    %40 = vector.extract_strided_slice %38 {offsets = [0, 0, 16], sizes = [4, 16, 16], strides = [1, 1, 1]} : vector<4x16x32xf32> to vector<4x16x16xf32>
    %41 = arith.truncf %39 : vector<4x16x16xf32> to vector<4x16x16xbf16>
    %42 = arith.truncf %40 : vector<4x16x16xf32> to vector<4x16x16xbf16>
    "tpu.trace_start"() <{level = 10 : i32, message = "hqd,hkd->hqk"}> : () -> ()
    %cst_14 = arith.constant dense<0.000000e+00> : vector<4x16x16xf32>
    %43 = tpu.matmul %41, %42, %cst_14 {dimension_numbers = #tpu.dot_dimension_numbers<[2], [2], [1], [1], [0, 0, 0, 1, 1, 1], [0], [0]>} : vector<4x16x16xbf16>, vector<4x16x16xbf16>, vector<4x16x16xf32> -> vector<4x16x16xf32>
    "tpu.trace_stop"() : () -> ()
    %44 = vector.shape_cast %1 : vector<16x16xf32> to vector<1x16x16xf32>
    %45 = vector.broadcast %44 : vector<1x16x16xf32> to vector<4x16x16xf32>
    %46 = arith.addf %43, %45 : vector<4x16x16xf32>
    %cst_15 = arith.constant dense<0xFF800000> : vector<4x16xf32>
    %47 = vector.multi_reduction <maximumf>, %46, %cst_15 [2] : vector<4x16x16xf32> to vector<4x16xf32>
    %48 = vector.shape_cast %47 : vector<4x16xf32> to vector<4x16x1xf32>
    %49 = vector.broadcast %48 : vector<4x16x1xf32> to vector<4x16x16xf32>
    %50 = arith.subf %46, %49 : vector<4x16x16xf32>
    %51 = math.exp %50 : vector<4x16x16xf32>
    %cst_16 = arith.constant dense<0.000000e+00> : vector<4x16xf32>
    %52 = vector.multi_reduction <add>, %51, %cst_16 [2] : vector<4x16x16xf32> to vector<4x16xf32>
    %53 = vector.shape_cast %52 : vector<4x16xf32> to vector<4x16x1xf32>
    %54 = tpu.reciprocal %53 {approx = true} : vector<4x16x1xf32> -> vector<4x16x1xf32>
    %55 = vector.broadcast %54 : vector<4x16x1xf32> to vector<4x16x16xf32>
    %56 = arith.mulf %51, %55 : vector<4x16x16xf32>
    %57 = arith.truncf %56 : vector<4x16x16xf32> to vector<4x16x16xbf16>
    %58 = arith.truncf %31 : vector<4x16x16xf32> to vector<4x16x16xbf16>
    "tpu.trace_start"() <{level = 10 : i32, message = "hqk,hkd->hqd"}> : () -> ()
    %cst_17 = arith.constant dense<0.000000e+00> : vector<4x16x16xf32>
    %59 = tpu.matmul %57, %58, %cst_17 {dimension_numbers = #tpu.dot_dimension_numbers<[2], [1], [1], [2], [0, 0, 0, 1, 1, 2], [0], [0]>} : vector<4x16x16xbf16>, vector<4x16x16xbf16>, vector<4x16x16xf32> -> vector<4x16x16xf32>
    "tpu.trace_stop"() : () -> ()
    %60 = vector.extract_strided_slice %59 {offsets = [0, 0, 0], sizes = [1, 16, 16], strides = [1, 1, 1]} : vector<4x16x16xf32> to vector<1x16x16xf32>
    %61 = vector.shape_cast %60 : vector<1x16x16xf32> to vector<16x16xf32>
    %62 = vector.extract_strided_slice %59 {offsets = [1, 0, 0], sizes = [1, 16, 16], strides = [1, 1, 1]} : vector<4x16x16xf32> to vector<1x16x16xf32>
    %63 = vector.shape_cast %62 : vector<1x16x16xf32> to vector<16x16xf32>
    %64 = vector.extract_strided_slice %59 {offsets = [2, 0, 0], sizes = [1, 16, 16], strides = [1, 1, 1]} : vector<4x16x16xf32> to vector<1x16x16xf32>
    %65 = vector.shape_cast %64 : vector<1x16x16xf32> to vector<16x16xf32>
    %66 = vector.extract_strided_slice %59 {offsets = [3, 0, 0], sizes = [1, 16, 16], strides = [1, 1, 1]} : vector<4x16x16xf32> to vector<1x16x16xf32>
    %67 = vector.shape_cast %66 : vector<1x16x16xf32> to vector<16x16xf32>
    %68 = tpu.concatenate %61, %63, %65, %67 in 1 : vector<16x16xf32>, vector<16x16xf32>, vector<16x16xf32>, vector<16x16xf32> -> vector<16x64xf32>
    %69 = arith.truncf %68 : vector<16x64xf32> to vector<16x64xbf16>
    %c0_18 = arith.constant 0 : index
    %c0_19 = arith.constant 0 : index
    %70 = vector.load %arg6[%c0_18, %c0_19] : memref<64x64xbf16, #tpu.memory_space<vmem>>, vector<64x64xbf16>
    %cst_20 = arith.constant dense<0.000000e+00> : vector<16x64xf32>
    %71 = tpu.matmul %69, %70, %cst_20 {dimension_numbers = #tpu.dot_dimension_numbers<[1], [0], [0], [1], [0, 0, 1, 1], [], []>} : vector<16x64xbf16>, vector<64x64xbf16>, vector<16x64xf32> -> vector<16x64xf32>
    %c0_21 = arith.constant 0 : index
    %c0_22 = arith.constant 0 : index
    %72 = vector.load %arg7[%c0_21, %c0_22] : memref<1x64xf32, #tpu.memory_space<vmem>>, vector<1x64xf32>
    %73 = vector.broadcast %72 : vector<1x64xf32> to vector<16x64xf32>
    %74 = arith.addf %71, %73 : vector<16x64xf32>
    %75 = arith.addf %0, %74 : vector<16x64xf32>
    %c0_23 = arith.constant 0 : index
    %c0_24 = arith.constant 0 : index
    %76 = vector.load %arg8[%c0_23, %c0_24] : memref<1x64xf32, #tpu.memory_space<vmem>>, vector<1x64xf32>
    %77 = arith.mulf %75, %75 : vector<16x64xf32>
    %cst_25 = arith.constant dense<0.000000e+00> : vector<16xf32>
    %78 = vector.multi_reduction <add>, %77, %cst_25 [1] : vector<16x64xf32> to vector<16xf32>
    %79 = vector.shape_cast %78 : vector<16xf32> to vector<16x1xf32>
    %cst_26 = arith.constant 6.400000e+01 : f32
    %80 = vector.broadcast %cst_26 : f32 to vector<16x1xf32>
    %81 = arith.divf %79, %80 : vector<16x1xf32>
    %cst_27 = arith.constant 9.99999997E-7 : f32
    %82 = vector.broadcast %cst_27 : f32 to vector<16x1xf32>
    %83 = arith.addf %81, %82 : vector<16x1xf32>
    %84 = math.rsqrt %83 : vector<16x1xf32>
    %85 = vector.broadcast %84 : vector<16x1xf32> to vector<16x64xf32>
    %86 = arith.mulf %75, %85 : vector<16x64xf32>
    %87 = vector.broadcast %76 : vector<1x64xf32> to vector<16x64xf32>
    %88 = arith.mulf %86, %87 : vector<16x64xf32>
    %89 = arith.truncf %88 : vector<16x64xf32> to vector<16x64xbf16>
    %c0_28 = arith.constant 0 : index
    %c0_29 = arith.constant 0 : index
    %90 = vector.load %arg9[%c0_28, %c0_29] : memref<64x256xbf16, #tpu.memory_space<vmem>>, vector<64x256xbf16>
    %cst_30 = arith.constant dense<0.000000e+00> : vector<16x256xf32>
    %91 = tpu.matmul %89, %90, %cst_30 {dimension_numbers = #tpu.dot_dimension_numbers<[1], [0], [0], [1], [0, 0, 1, 1], [], []>} : vector<16x64xbf16>, vector<64x256xbf16>, vector<16x256xf32> -> vector<16x256xf32>
    %92 = vector.extract_strided_slice %91 {offsets = [0, 0], sizes = [16, 128], strides = [1, 1]} : vector<16x256xf32> to vector<16x128xf32>
    %93 = vector.extract_strided_slice %91 {offsets = [0, 128], sizes = [16, 128], strides = [1, 1]} : vector<16x256xf32> to vector<16x128xf32>
    %cst_31 = arith.constant 0.000000e+00 : f32
    %94 = vector.broadcast %cst_31 : f32 to vector<16x128xf32>
    %95 = arith.subf %94, %92 : vector<16x128xf32>
    %96 = math.exp %95 : vector<16x128xf32>
    %cst_32 = arith.constant 1.000000e+00 : f32
    %97 = vector.broadcast %cst_32 : f32 to vector<16x128xf32>
    %98 = arith.addf %97, %96 : vector<16x128xf32>
    %99 = tpu.reciprocal %98 {approx = true} : vector<16x128xf32> -> vector<16x128xf32>
    %100 = arith.mulf %92, %99 : vector<16x128xf32>
    %101 = arith.mulf %100, %93 : vector<16x128xf32>
    %102 = arith.truncf %101 : vector<16x128xf32> to vector<16x128xbf16>
    %c0_33 = arith.constant 0 : index
    %c0_34 = arith.constant 0 : index
    %103 = vector.load %arg10[%c0_33, %c0_34] : memref<128x64xbf16, #tpu.memory_space<vmem>>, vector<128x64xbf16>
    %cst_35 = arith.constant dense<0.000000e+00> : vector<16x64xf32>
    %104 = tpu.matmul %102, %103, %cst_35 {dimension_numbers = #tpu.dot_dimension_numbers<[1], [0], [0], [1], [0, 0, 1, 1], [], []>} : vector<16x128xbf16>, vector<128x64xbf16>, vector<16x64xf32> -> vector<16x64xf32>
    %c0_36 = arith.constant 0 : index
    %c0_37 = arith.constant 0 : index
    %105 = vector.load %arg11[%c0_36, %c0_37] : memref<1x64xf32, #tpu.memory_space<vmem>>, vector<1x64xf32>
    %106 = vector.broadcast %105 : vector<1x64xf32> to vector<16x64xf32>
    %107 = arith.addf %104, %106 : vector<16x64xf32>
    %108 = arith.addf %75, %107 : vector<16x64xf32>
    %c0_38 = arith.constant 0 : index
    %c0_39 = arith.constant 0 : index
    %109 = vector.load %arg12[%c0_38, %c0_39] : memref<16x64xf32, #tpu.memory_space<vmem>>, vector<16x64xf32>
    tpu.vector_store %arg12[%c0_38, %c0_39], %108 {strides = array<i32>} : memref<16x64xf32, #tpu.memory_space<vmem>>, vector<16x64xf32>,
    return
  }
}

</mosaic_0001>

<bundles_post_ra>
// kernel: tile.14
= control target key start
LH: loop header
LB: loop body
LE: loop exit
PB: predicated region body
PF: predicated region fallthrough
CT: control target
= control target key end

     0   :  { %vm82_vm0 = vcmask 1047556   ;;  %vm84_vm1 = vcmask 130048   ;;  %vm103_vm2 = vcmask 261248   ;;  %s225_s0 = inlined_call_operand.vmem [shape: f32[2,8,2,16], index: 0, kind: input, shape index: {}]   ;;  %s226_s1 = inlined_call_operand.vmem [shape: f32[16,32], index: 1, kind: output, shape index: {}]  }
   0x1   :  { %v138_v0 = vld [vmem:[%s225_s0 + $0xe] sm:$0x3]  ;;  %v139_v1 = vld [vmem:[%s225_s0 + $0xc] sm:$0x3]  ;;  %v140_v2 = vld [vmem:[%s225_s0 + $0xa] sm:$0x3] }
   0x2   :  { %48 = vst [vmem:[#allocation0 + $0x38] sm:$0x3] %v138_v0  ;;  %53 = vst [vmem:[#allocation0 + $0x30] sm:$0x3] %v139_v1  ;;  %v141_v3 = vld [vmem:[%s225_s0 + $0x8] sm:$0x3] }
   0x3   :  { %58 = vst [vmem:[#allocation0 + $0x28] sm:$0x3] %v140_v2  ;;  %v142_v4 = vld [vmem:[%s225_s0 + $0x6] sm:$0x3]  ;;  %v143_v5 = vld [vmem:[%s225_s0 + $0x4] sm:$0x3] }
   0x4   :  { %63 = vst [vmem:[#allocation0 + $0x20] sm:$0x3] %v141_v3  ;;  %68 = vst [vmem:[#allocation0 + $0x18] sm:$0x3] %v142_v4  ;;  %v144_v6 = vld [vmem:[%s225_s0 + $0x2] sm:$0x3] }
   0x5   :  { %73 = vst [vmem:[#allocation0 + $0x10] sm:$0x3] %v143_v5  ;;  %v78_v7 = vld [vmem:[%s225_s0] sm:$0x3]  ;;  %77 = vst [vmem:[#allocation0 + $0x8] sm:$0x3] %v144_v6 }
   0x6   :  { %79 = vst [vmem:[#allocation0] sm:$0x3] %v78_v7  ;;  %v130_v8 = vld [vmem:[%s225_s0 + $0x1e] sm:$0x3]  ;;  %v131_v9 = vld [vmem:[%s225_s0 + $0x1c] sm:$0x3] }
   0x7   :  { %v132_v10 = vld [vmem:[%s225_s0 + $0x1a] sm:$0x3]  ;;  %8 = vst [vmem:[#allocation0 + $0x78] sm:$0x3] %v130_v8  ;;  %13 = vst [vmem:[#allocation0 + $0x70] sm:$0x3] %v131_v9 }
   0x8   :  { %18 = vst [vmem:[#allocation0 + $0x68] sm:$0x3] %v132_v10  ;;  %v133_v11 = vld [vmem:[%s225_s0 + $0x18] sm:$0x3]  ;;  %v134_v12 = vld [vmem:[%s225_s0 + $0x16] sm:$0x3] }
   0x9   :  { %v135_v13 = vld [vmem:[%s225_s0 + $0x14] sm:$0x3]  ;;  %23 = vst [vmem:[#allocation0 + $0x60] sm:$0x3] %v133_v11  ;;  %28 = vst [vmem:[#allocation0 + $0x58] sm:$0x3] %v134_v12 }
   0xa   :  { %33 = vst [vmem:[#allocation0 + $0x50] sm:$0x3] %v135_v13  ;;  %v136_v14 = vld [vmem:[%s225_s0 + $0x12] sm:$0x3]  ;;  %v137_v15 = vld [vmem:[%s225_s0 + $0x10] sm:$0x3] }
   0xb   :  { %38 = vst [vmem:[#allocation0 + $0x48] sm:$0x3] %v136_v14  ;;  %43 = vst [vmem:[#allocation0 + $0x40] sm:$0x3] %v137_v15  ;;  %s148_s0 = smov 16  }
   0xc   :  { %v98_v16 = vld [vmem:[#allocation0 + $0x1] ss:$8 sm:$0xf0]   ;;  %v81_v17 = vld [vmem:[#allocation0] ss:$8 sm:$0xf0]  }
   0xd   :  { %v96_v18 = vld [vmem:[#allocation0 + $0x1] ss:$8 sm:$0xf]   ;;  %v80_v19 = vld [vmem:[#allocation0] ss:$8 sm:$0xf]  }
   0xe   :  { %v100_v20 = vsel %vm82_vm0, %v98_v16, %v96_v18  ;;  %v83_v21 = vsel %vm82_vm0, %v81_v17, %v80_v19 }
   0xf   :  { %101 = vrot.lane.b32.xlu0 %v100_v20, %s148_s0  ;;  %85 = vst.msk [vmem:[%s226_s1] sm:$0xff] %vm84_vm1, %v83_v21  }
  0x10   :  { %v108_v22 = vld [vmem:[#allocation0 + $0x41] ss:$8 sm:$0xf0]   ;;  %v89_v23 = vld [vmem:[#allocation0 + $0x40] ss:$8 sm:$0xf0]  }
  0x12   :  { %v106_v24 = vld [vmem:[#allocation0 + $0x41] ss:$8 sm:$0xf]   ;;  %v87_v25 = vld [vmem:[#allocation0 + $0x40] ss:$8 sm:$0xf]  }
  0x13   :  { %v110_v26 = vsel %vm82_vm0, %v108_v22, %v106_v24  ;;  %v91_v27 = vsel %vm82_vm0, %v89_v23, %v87_v25 }
  0x14   :  { %145 = vst.msk [vmem:[%s226_s1 + $0x8] sm:$0xff] %vm84_vm1, %v91_v27   ;;  %111 = vrot.lane.b32.xlu0 %v110_v26, %s148_s0 }
  0x81   :  { %v102_v28 = vpop.permute.xlu0 %101  }
  0x82   :  { %104 = vst.msk [vmem:[%s226_s1] sm:$0xff] %vm103_vm2, %v102_v28  }
  0x86   :  { %v112_v29 = vpop.permute.xlu0 %111  }
  0x87   :  { %146 = vst.msk [vmem:[%s226_s1 + $0x8] sm:$0xff] %vm103_vm2, %v112_v29  }

// kernel: tile.13
= control target key start
LH: loop header
LB: loop body
LE: loop exit
PB: predicated region body
PF: predicated region fallthrough
CT: control target
= control target key end

     0   :  { %s154_s0 = inlined_call_operand.vmem [shape: f32[8,16], index: 0, kind: input, shape index: {}]   ;;  %s155_s1 = inlined_call_operand.vmem [shape: f32[2,8,2,16], index: 1, kind: output, shape index: {}]  }
   0x1   :  { %v4_v0 = vld [vmem:[%s154_s0] ss:$0 sm:$0xff]  ;;  %v51_v1 = vld [vmem:[%s154_s0 + $0x1] ss:$0 sm:$0xff]  ;;  %v54_v2 = vld [vmem:[%s154_s0 + $0x2] ss:$0 sm:$0xff] }
   0x2   :  { %5 = vst [vmem:[%s155_s1] sm:$0x3] %v4_v0  ;;  %50 = vst [vmem:[%s155_s1 + $0x10] sm:$0x3] %v4_v0  ;;  %v57_v3 = vld [vmem:[%s154_s0 + $0x3] ss:$0 sm:$0xff] }
   0x3   :  { %52 = vst [vmem:[%s155_s1 + $0x2] sm:$0x3] %v51_v1  ;;  %53 = vst [vmem:[%s155_s1 + $0x12] sm:$0x3] %v51_v1  ;;  %v60_v4 = vld [vmem:[%s154_s0 + $0x4] ss:$0 sm:$0xff] }
   0x4   :  { %55 = vst [vmem:[%s155_s1 + $0x4] sm:$0x3] %v54_v2  ;;  %56 = vst [vmem:[%s155_s1 + $0x14] sm:$0x3] %v54_v2  ;;  %v63_v5 = vld [vmem:[%s154_s0 + $0x5] ss:$0 sm:$0xff] }
   0x5   :  { %58 = vst [vmem:[%s155_s1 + $0x6] sm:$0x3] %v57_v3  ;;  %59 = vst [vmem:[%s155_s1 + $0x16] sm:$0x3] %v57_v3  ;;  %v66_v6 = vld [vmem:[%s154_s0 + $0x6] ss:$0 sm:$0xff] }
   0x6   :  { %61 = vst [vmem:[%s155_s1 + $0x8] sm:$0x3] %v60_v4  ;;  %62 = vst [vmem:[%s155_s1 + $0x18] sm:$0x3] %v60_v4  ;;  %v69_v7 = vld [vmem:[%s154_s0 + $0x7] ss:$0 sm:$0xff] }
   0x7   :  { %64 = vst [vmem:[%s155_s1 + $0xa] sm:$0x3] %v63_v5  ;;  %65 = vst [vmem:[%s155_s1 + $0x1a] sm:$0x3] %v63_v5 }
   0x8   :  { %67 = vst [vmem:[%s155_s1 + $0xc] sm:$0x3] %v66_v6  ;;  %68 = vst [vmem:[%s155_s1 + $0x1c] sm:$0x3] %v66_v6 }
   0x9   :  { %70 = vst [vmem:[%s155_s1 + $0xe] sm:$0x3] %v69_v7  ;;  %71 = vst [vmem:[%s155_s1 + $0x1e] sm:$0x3] %v69_v7 }

// kernel: telechat2_decoder_layer.1
= control target key start
LH: loop header
LB: loop body
LE: loop exit
PB: predicated region body
PF: predicated region fallthrough
CT: control target
= control target key end

     0   :  { %vm54_vm0 = vcmask 523264   ;;  %s1958_s0 = inlined_call_operand.vmem [shape: f32[16,64], index: 0, kind: input, shape index: {}]   ;;  %s1959_s1 = inlined_call_operand.vmem [shape: f32[16,16], index: 1, kind: input, shape index: {}]   ;;  %s1960_s2 = inlined_call_operand.vmem [shape: f32[16,32], index: 2, kind: input, shape index: {}]   ;;  %s1961_s3 = inlined_call_operand.vmem [shape: f32[16,32], index: 3, kind: input, shape index: {}]   ;;  %s1962_s4 = inlined_call_operand.vmem [shape: f32[1,64], index: 4, kind: input, shape index: {}]   ;;  %s1963_s5 = inlined_call_operand.vmem [shape: bf16[64,320], index: 5, kind: input, shape index: {}]   ;;  %s1964_s6 = inlined_call_operand.vmem [shape: bf16[64,64], index: 6, kind: input, shape index: {}]   ;;  %s1965_s7 = inlined_call_operand.vmem [shape: f32[1,64], index: 7, kind: input, shape index: {}]   ;;  %s1966_s8 = inlined_call_operand.vmem [shape: f32[1,64], index: 8, kind: input, shape index: {}]   ;;  %s1967_s9 = inlined_call_operand.vmem [shape: bf16[64,256], index: 9, kind: input, shape index: {}]   ;;  %s1968_s10 = inlined_call_operand.vmem [shape: bf16[128,64], index: 10, kind: input, shape index: {}]   ;;  %s1969_s11 = inlined_call_operand.vmem [shape: f32[1,64], index: 11, kind: input, shape index: {}]   ;;  %s1970_s12 = inlined_call_operand.hbm [shape: f32[16,64], index: 12, kind: output, shape index: {}]  }
   0x1   :  { %v1618_v0 = vld [vmem:[%s1958_s0] sm:$0xff]  ;;  %v1623_v1 = vld [vmem:[%s1958_s0 + $0x8] sm:$0xff] }
   0x2   :  { %v52_v2 = vmul.f32 %v1618_v0, %v1618_v0  ;;  %v53_v3 = vmul.f32 %v1623_v1, %v1623_v1 }
   0x4   :  { %v55_v4 = vsel %vm54_vm0, %v52_v2, 0.0  ;;  %v58_v5 = vsel %vm54_vm0, %v53_v3, 0.0 }
   0x5   :  { %56 = vadd.xlane.f32.xlu0 %v55_v4 }
   0x9   :  { %59 = vadd.xlane.f32.xlu0 %v58_v5 }
   0xa   :  { %17 = vsyncpa [#allocation3], 0  ;;  %v1426_v6 = vld [vmem:[%s1963_s5 + $0x4] ss:$12 sps:$4 sm:$0xff]   ;;  %v1428_v7 = vld [vmem:[%s1963_s5] ss:$12 sps:$4 sm:$0xff]  }
   0xb   :  { %162 = vmatprep.subr.bf16.mxu1 %v1426_v6  ;;  %v1429_v8 = vld [vmem:[%s1963_s5 + $0x1c] ss:$12 sps:$4 sm:$0xff]   ;;  %v1431_v9 = vld [vmem:[%s1963_s5 + $0x18] ss:$12 sps:$4 sm:$0xff]   ;;  %v1432_v10 = vld [vmem:[%s1963_s5 + $0x34] ss:$12 sps:$4 sm:$0xff]  }
   0xc   :  { %163 = vmatpush1.bf16.msra.mxu1 %v1428_v7  ;;  %v1538_v11 = vmov 0   ;;  %v1539_v12 = vmov 0.0   ;;  %v1434_v13 = vld [vmem:[%s1963_s5 + $0x30] ss:$12 sps:$4 sm:$0xff]   ;;  %v1435_v14 = vld [vmem:[%s1963_s5 + $0x4c] ss:$12 sps:$4 sm:$0xff]  }
   0xd   :  { %164 = vmatprep.subr.bf16.mxu1 %v1429_v8  ;;  %194 = vmatprep.mubr.bf16.mxu1 %v1538_v11  ;;  %v1437_v15 = vld [vmem:[%s1963_s5 + $0x48] ss:$12 sps:$4 sm:$0xff]   ;;  %vm1540_vm1 = vmmov 0   ;;  %v49_v16 = vld [vmem:[%s1961_s3] sm:$0xff]  ;;  %s1541_s24 = smov 32   ;;  %s1542_s16 = smov 48  }
   0xe   :  { %1319 = vmatprep.subr.bf16.mxu0 %v1539_v12  ;;  %1321 = vmatprep.mubr.msk.bf16.mxu0 %vm1540_vm1, %v1539_v12  ;;  %v50_v17 = vld [vmem:[%s1961_s3 + $0x8] sm:$0xff]  ;;  %v1224_v27 = vld [vmem:[%s1962_s4] ss:$0 sm:$0xff]  ;;  %v1440_v34 = vld [vmem:[%s1963_s5 + $0x38] ss:$12 sps:$4 sm:$0xff]   ;;  %s1544_s17 = smov 16  }
   0xf   :  { %294 = vrot.lane.b32.xlu1 %v49_v16, %s1541_s24  ;;  %v1438_v31 = vld [vmem:[%s1963_s5 + $0x8] ss:$12 sps:$4 sm:$0xff]   ;;  %v1439_v33 = vld [vmem:[%s1963_s5 + $0x20] ss:$12 sps:$4 sm:$0xff]   ;;  %v1441_v35 = vld [vmem:[%s1963_s5 + $0x50] ss:$12 sps:$4 sm:$0xff]  }
  0x10   :  { %165 = vmatpush1.bf16.msra.mxu1 %v1431_v9  ;;  %s1543_s5 = smov 96   ;;  %vm258_vm2 = vcmask 392192   ;;  %vm279_vm3 = vcmask 130048   ;;  %v48_v6 = vld [vmem:[%s1960_s2 + $0x8] sm:$0xff]  ;;  %v47_v8 = vld [vmem:[%s1960_s2] sm:$0xff]  ;;  %s1545_s2 = smov 112  }
  0x11   :  { %166 = vmatprep.subr.bf16.mxu1 %v1432_v10  ;;  %vm866_vm4 = vcmask 261120   ;;  %s1547_s19 = smov [#allocation2]  }
  0x12   :  { %s1213_s20 = sshll.u32 %s1547_s19, 4  ;;  %s1214_s20 = int_to_ptr.vmem [resolvable:$true] %s1213_s20 }
  0x13   :  { %296 = vrot.lane.b32.xlu1 %v50_v17, %s1541_s24  ;;  %s1514_s21 = scalar_lea.vmem %s1214_s20, 256  ;;  %p1519_p1 = scmp.lt.s32.totalorder %s1214_s20, %s1214_s20 }
  0x14   :  { %167 = vmatpush1.bf16.msra.mxu1 %v1434_v13  ;;  %p1515_p0 = scmp.ne.s32.totalorder %s1214_s20, %s1514_s21  ;;  %p1520_p2 = scmp.lt.s32.totalorder %s1514_s21, %s1514_s21 }
  0x15   :  { %168 = vmatprep.subr.bf16.mxu1 %v1435_v14 }
  0x16   :  { %p1521_p3 = por %p1520_p2, %p1519_p1 }
  0x18   :  { %169 = vmatpush1.bf16.msra.mxu1 %v1437_v15  ;;  %p1522_p4 = pnand %p1521_p3, %p1515_p0 }
  0x19   :  { %1307 = vmatprep.subr.bf16.mxu1 %v1539_v12 }
  0x81   :  { %v295_v41 = vpop.permute.xlu1 %294 }
  0x85   :  { %v297_v46 = vpop.permute.xlu1 %296 }
  0x92   :  { %v57_v18 = vpop.xlane.xlu0 %56 }
  0x93   :  { %v62_v19 = vmul.f32 0.015625, %v57_v18 }
  0x95   :  { %v64_v20 = vadd.f32 1e-06, %v62_v19 }
  0x96   :  { %v60_v21 = vpop.xlane.xlu0 %59 }
  0x97   :  { %1466 = vrsqrt.f32 %v64_v20  ;;  %v63_v22 = vmul.f32 0.015625, %v60_v21 }
  0x99   :  { %v65_v23 = vadd.f32 1e-06, %v63_v22 }
  0x9b   :  { %1468 = vrsqrt.f32 %v65_v23 }
  0xa1   :  { %v1467_v24 = vpop.eup %1466 }
  0xa2   :  { %v68_v25 = vmul.f32 %v1467_v24, %v1618_v0 }
  0xa4   :  { %v76_v29 = vmul.f32 %v1224_v27, %v68_v25 }
  0xa5   :  { %v1469_v26 = vpop.eup %1468 }
  0xa6   :  { %v69_v28 = vmul.f32 %v1469_v26, %v1623_v1 }
  0xa8   :  { %v77_v30 = vmul.f32 %v1224_v27, %v69_v28 }
  0xaa   :  { %v78_v32 = vpack.c.bf16 %v77_v30, %v76_v29 }
  0xac   :  { %1237 = vmatmul.mubr.msk.bf16.vlgmr.msra.gmra.mrb[0].mxu1 %vm54_vm0, %v78_v32 }
  0xad   :  { %1308 = vmatpush3.bf16.msra.mxu1 %v1438_v31  ;;  %1315 = vmatprep.mubr.msk.bf16.mxu1 %vm1540_vm1, %v1539_v12 }
  0xae   :  { %1309 = vmatprep.subr.bf16.mxu1 %v1539_v12 }
  0xb1   :  { %1310 = vmatpush3.bf16.msra.mxu1 %v1439_v33 }
  0xb2   :  { %1311 = vmatprep.subr.bf16.mxu1 %v1539_v12 }
  0xb5   :  { %1312 = vmatpush3.bf16.msra.mxu1 %v1440_v34 }
  0xb6   :  { %1313 = vmatprep.subr.bf16.mxu1 %v1539_v12 }
  0xb9   :  { %1314 = vmatpush3.bf16.msra.mxu1 %v1441_v35 }
  0xba   :  { %1325 = vmatprep.subr.bf16.mxu1 %v1539_v12 }
  0xbc   :  { %1316 = vmatmul.mubr.msk.bf16.vlgmr.msra.gmra.mrb[4].mxu1 %vm54_vm0, %v78_v32 }
  0xbd   :  { %1327 = vmatprep.mubr.msk.bf16.mxu1 %vm1540_vm1, %v1539_v12 }
 0x17f   :  { %v1695_v36 = vpop.f32.mrb[0].mxu1 }
 0x180   :  { %250 = vrot.lane.b32.xlu1 %v1695_v36, %s1542_s16  ;;  %v198_v37 = vpop.f32.mrb[1].mxu1  ;;  %v300_v48 = vmul.f32 %v295_v41, %v1695_v36  ;;  %v284_v16 = vmul.f32 %v1695_v36, %v47_v8 }
 0x181   :  { %v1699_v38 = vpop.f32.mrb[2].mxu1 }
 0x182   :  { %254 = vrot.lane.b32.xlu0 %v1699_v38, %s1542_s16  ;;  %v202_v39 = vpop.f32.mrb[3].mxu1  ;;  %v644_v40 = vpack.c.bf16 %v1699_v38, %v1695_v36  ;;  %v301_v47 = vmul.f32 %v297_v46, %v1699_v38  ;;  %v285_v15 = vmul.f32 %v1699_v38, %v48_v6 }
 0x184   :  { %252 = vrot.lane.b32.xlu1 %v198_v37, %s1542_s16 }
 0x188   :  { %263 = vrot.lane.b32.xlu1 %v198_v37, %s1543_s5 }
 0x18c   :  { %271 = vrot.lane.b32.xlu1 %v198_v37, %s1544_s17 }
 0x18f   :  { %v239_v42 = vpop.f32.mrb[4].mxu1 }
 0x190   :  { %273 = vrot.lane.b32.xlu0 %v239_v42, %s1544_s17  ;;  %v1317_v43 = vpop.f32.mrb[5].mxu1  ;;  %256 = vrot.lane.b32.xlu1 %v202_v39, %s1542_s16 }
 0x191   :  { %v242_v44 = vpop.f32.mrb[6].mxu1 }
 0x192   :  { %v1318_v45 = vpop.f32.mrb[7].mxu1 }
 0x194   :  { %277 = vrot.lane.b32.xlu0 %v242_v44, %s1544_s17  ;;  %265 = vrot.lane.b32.xlu1 %v202_v39, %s1543_s5 }
 0x198   :  { %318 = vrot.lane.b32.xlu0 %v301_v47, %s1543_s5  ;;  %275 = vrot.lane.b32.xlu1 %v202_v39, %s1544_s17 }
 0x19c   :  { %316 = vrot.lane.b32.xlu1 %v300_v48, %s1543_s5 }
 0x1f2   :  { %v251_v49 = vpop.permute.xlu1 %250 }
 0x1f4   :  { %v255_v55 = vpop.permute.xlu0 %254 }
 0x1f6   :  { %v253_v50 = vpop.permute.xlu1 %252 }
 0x1f7   :  { %v1718_v51 = vsel %vm258_vm2, %v251_v49, %v253_v50 }
 0x1f8   :  { %v302_v52 = vmul.f32 %v295_v41, %v1718_v51  ;;  %v286_v22 = vmul.f32 %v1718_v51, %v47_v8 }
 0x1fa   :  { %v1721_v53 = vpop.permute.xlu1 %263  ;;  %320 = vrot.lane.b32.xlu1 %v302_v52, %s1543_s5 }
 0x1fb   :  { %v304_v54 = vmul.f32 %v295_v41, %v1721_v53  ;;  %v288_v28 = vmul.f32 %v1721_v53, %v47_v8 }
 0x1fe   :  { %v272_v56 = vpop.permute.xlu1 %271  ;;  %324 = vrot.lane.b32.xlu1 %v304_v54, %s1543_s5 }
 0x202   :  { %v274_v57 = vpop.permute.xlu0 %273  ;;  %v257_v58 = vpop.permute.xlu1 %256 }
 0x203   :  { %v1727_v59 = vsel %vm279_vm3, %v272_v56, %v274_v57  ;;  %v1730_v60 = vsel %vm258_vm2, %v255_v55, %v257_v58  ;;  %v45_v55 = vld [vmem:[%s1959_s1] sm:$0xff]  ;;  %v46_v57 = vld [vmem:[%s1959_s1 + $0x8] sm:$0xff]  ;;  %s1546_s1 = smov 64  }
 0x204   :  { %v306_v61 = vmul.f32 %v295_v41, %v1727_v59  ;;  %v303_v62 = vmul.f32 %v297_v46, %v1730_v60  ;;  %v645_v63 = vpack.c.bf16 %v1730_v60, %v1718_v51  ;;  %v287_v23 = vmul.f32 %v1730_v60, %v48_v6 }
 0x205   :  { %v290_v35 = vmul.f32 %v1727_v59, %v47_v8 }
 0x206   :  { %328 = vrot.lane.b32.xlu1 %v306_v61, %s1543_s5  ;;  %v278_v2 = vpop.permute.xlu0 %277  ;;  %v1737_v3 = vpop.permute.xlu1 %265  ;;  %322 = vrot.lane.b32.xlu0 %v303_v62, %s1543_s5 }
 0x207   :  { %v305_v4 = vmul.f32 %v297_v46, %v1737_v3  ;;  %v646_v5 = vpack.c.bf16 %v1737_v3, %v1721_v53  ;;  %v289_v30 = vmul.f32 %v1737_v3, %v48_v6 }
 0x20a   :  { %v276_v7 = vpop.permute.xlu1 %275  ;;  %326 = vrot.lane.b32.xlu0 %v305_v4, %s1543_s5  ;;  %v319_v10 = vpop.permute.xlu0 %318 }
 0x20b   :  { %v1751_v9 = vsel %vm279_vm3, %v276_v7, %v278_v2  ;;  %v341_v18 = vadd.f32 %v319_v10, %v285_v15 }
 0x20c   :  { %v307_v13 = vmul.f32 %v297_v46, %v1751_v9  ;;  %v647_v14 = vpack.c.bf16 %v1751_v9, %v1727_v59  ;;  %v291_v39 = vmul.f32 %v1751_v9, %v48_v6 }
 0x20e   :  { %v317_v17 = vpop.permute.xlu1 %316  ;;  %330 = vrot.lane.b32.xlu0 %v307_v13, %s1543_s5 }
 0x20f   :  { %v340_v19 = vadd.f32 %v317_v17, %v284_v16 }
 0x211   :  { %v348_v20 = vpack.c.bf16 %v341_v18, %v340_v19 }
 0x213   :  { %353 = vrot.lane.b32.xlu1 %v348_v20, %s1545_s2 }
 0x26c   :  { %v321_v21 = vpop.permute.xlu1 %320 }
 0x26d   :  { %v342_v25 = vadd.f32 %v321_v21, %v286_v22 }
 0x270   :  { %v325_v27 = vpop.permute.xlu1 %324 }
 0x271   :  { %v344_v32 = vadd.f32 %v325_v27, %v288_v28 }
 0x278   :  { %v323_v24 = vpop.permute.xlu0 %322  ;;  %v329_v34 = vpop.permute.xlu1 %328 }
 0x279   :  { %v343_v26 = vadd.f32 %v323_v24, %v287_v23  ;;  %v346_v42 = vadd.f32 %v329_v34, %v290_v35 }
 0x27b   :  { %v349_v29 = vpack.c.bf16 %v343_v26, %v342_v25 }
 0x27c   :  { %v327_v31 = vpop.permute.xlu0 %326 }
 0x27d   :  { %v345_v33 = vadd.f32 %v327_v31, %v289_v30  ;;  %403 = vrot.lane.b32.xlu0 %v349_v29, %s1545_s2 }
 0x27f   :  { %v350_v37 = vpack.c.bf16 %v345_v33, %v344_v32 }
 0x280   :  { %v331_v41 = vpop.permute.xlu0 %330 }
 0x281   :  { %v347_v43 = vadd.f32 %v331_v41, %v291_v39  ;;  %453 = vrot.lane.b32.xlu1 %v350_v37, %s1545_s2 }
 0x283   :  { %v351_v44 = vpack.c.bf16 %v347_v43, %v346_v42 }
 0x285   :  { %v354_v45 = vpop.permute.xlu1 %353  ;;  %503 = vrot.lane.b32.xlu0 %v351_v44, %s1545_s2 }
 0x286   :  { %v359_v46 = vsel %vm279_vm3, %v354_v45, 0 }
 0x287   :  { %1320 = vmatpush3.bf16.xpose.msra.mxu0 %v359_v46 }
 0x288   :  { %1331 = vmatprep.subr.bf16.mxu0 %v1539_v12 }
 0x28e   :  { %1322 = vmatmul.mubr.msk.bf16.vlgmr.msra.gmra.mrb[0].mxu0 %vm279_vm3, %v348_v20 }
 0x28f   :  { %1333 = vmatprep.mubr.msk.bf16.mxu0 %vm1540_vm1, %v1539_v12 }
 0x2ef   :  { %v404_v47 = vpop.permute.xlu0 %403 }
 0x2f0   :  { %v409_v48 = vsel %vm279_vm3, %v404_v47, 0 }
 0x2f1   :  { %1326 = vmatpush3.bf16.xpose.msra.mxu1 %v409_v48 }
 0x2f2   :  { %1337 = vmatprep.subr.bf16.mxu1 %v1539_v12 }
 0x2f3   :  { %v454_v49 = vpop.permute.xlu1 %453 }
 0x2f4   :  { %v459_v50 = vsel %vm279_vm3, %v454_v49, 0 }
 0x2f5   :  { %1332 = vmatpush3.bf16.xpose.msra.mxu0 %v459_v50 }
 0x2f6   :  { %1343 = vmatprep.subr.bf16.mxu0 %v1539_v12 }
 0x2f7   :  { %v504_v52 = vpop.permute.xlu0 %503 }
 0x2f8   :  { %v509_v54 = vsel %vm279_vm3, %v504_v52, 0  ;;  %1328 = vmatmul.mubr.msk.bf16.vlgmr.msra.gmra.mrb[8].mxu1 %vm279_vm3, %v349_v29 }
 0x2f9   :  { %1338 = vmatpush3.bf16.xpose.msra.mxu1 %v509_v54  ;;  %1339 = vmatprep.mubr.msk.bf16.mxu1 %vm1540_vm1, %v1539_v12 }
 0x2fa   :  { %1349 = vmatprep.subr.bf16.mxu1 %v1539_v12 }
 0x2fc   :  { %1334 = vmatmul.mubr.msk.bf16.vlgmr.msra.gmra.mrb[4].mxu0 %vm279_vm3, %v350_v37 }
 0x2fd   :  { %1345 = vmatprep.mubr.msk.bf16.mxu0 %vm1540_vm1, %v1539_v12 }
 0x300   :  { %1340 = vmatmul.mubr.msk.bf16.vlgmr.msra.gmra.mrb[12].mxu1 %vm279_vm3, %v351_v44 }
 0x301   :  { %1351 = vmatprep.mubr.msk.bf16.mxu1 %vm1540_vm1, %v1539_v12 }
 0x361   :  { %v395_v56 = vpop.f32.mrb[0].mxu0 }
 0x362   :  { %v396_v58 = vadd.f32 %v395_v56, %v45_v55  ;;  %v1323_v61 = vpop.f32.mrb[1].mxu0 }
 0x363   :  { %v398_v62 = vpop.f32.mrb[2].mxu0 }
 0x364   :  { %v399_v2 = vadd.f32 %v398_v62, %v46_v57  ;;  %v1324_v4 = vpop.f32.mrb[3].mxu0  ;;  %v552_v6 = vsel %vm279_vm3, %v396_v58, -inf }
 0x365   :  { %553 = vmax.xlane.f32.xlu1 %v552_v6 }
 0x366   :  { %v555_v7 = vsel %vm279_vm3, %v399_v2, -inf }
 0x367   :  { %556 = vmax.xlane.f32.xlu0 %v555_v7 }
 0x3cb   :  { %v445_v8 = vpop.f32.mrb[8].mxu1 }
 0x3cc   :  { %v446_v10 = vadd.f32 %v445_v8, %v45_v55  ;;  %v1329_v13 = vpop.f32.mrb[9].mxu1 }
 0x3cd   :  { %v448_v15 = vpop.f32.mrb[10].mxu1 }
 0x3ce   :  { %v449_v16 = vadd.f32 %v448_v15, %v46_v57  ;;  %v1330_v17 = vpop.f32.mrb[11].mxu1  ;;  %v558_v18 = vsel %vm279_vm3, %v446_v10, -inf }
 0x3cf   :  { %v495_v19 = vpop.f32.mrb[4].mxu0  ;;  %559 = vmax.xlane.f32.xlu0 %v558_v18 }
 0x3d0   :  { %v496_v20 = vadd.f32 %v495_v19, %v45_v55  ;;  %v1335_v21 = vpop.f32.mrb[5].mxu0  ;;  %v561_v22 = vsel %vm279_vm3, %v449_v16, -inf }
 0x3d1   :  { %v498_v23 = vpop.f32.mrb[6].mxu0  ;;  %562 = vmax.xlane.f32.xlu1 %v561_v22 }
 0x3d2   :  { %v499_v24 = vadd.f32 %v498_v23, %v46_v57  ;;  %v1336_v25 = vpop.f32.mrb[7].mxu0  ;;  %v564_v26 = vsel %vm279_vm3, %v496_v20, -inf }
 0x3d3   :  { %565 = vmax.xlane.f32.xlu0 %v564_v26  ;;  %v545_v27 = vpop.f32.mrb[12].mxu1 }
 0x3d4   :  { %v546_v28 = vadd.f32 %v545_v27, %v45_v55  ;;  %v1341_v29 = vpop.f32.mrb[13].mxu1  ;;  %v567_v30 = vsel %vm279_vm3, %v499_v24, -inf }
 0x3d5   :  { %568 = vmax.xlane.f32.xlu1 %v567_v30  ;;  %v548_v31 = vpop.f32.mrb[14].mxu1 }
 0x3d6   :  { %v549_v32 = vadd.f32 %v548_v31, %v46_v57  ;;  %v1342_v33 = vpop.f32.mrb[15].mxu1  ;;  %v570_v34 = vsel %vm279_vm3, %v546_v28, -inf }
 0x3d7   :  { %571 = vmax.xlane.f32.xlu0 %v570_v34 }
 0x3d8   :  { %v573_v35 = vsel %vm279_vm3, %v549_v32, -inf }
 0x3d9   :  { %574 = vmax.xlane.f32.xlu1 %v573_v35 }
 0x3ea   :  { %697 = vrot.lane.b32.xlu1 %v645_v63, %s1546_s1 }
 0x3ed   :  { %649 = vrot.lane.b32.xlu0 %v644_v40, %s1546_s1 }
 0x3f2   :  { %v554_v37 = vpop.xlane.xlu1 %553 }
 0x3f3   :  { %v576_v41 = vsub.f32 %v396_v58, %v554_v37 }
 0x3f4   :  { %v557_v39 = vpop.xlane.xlu0 %556 }
 0x3f5   :  { %v577_v42 = vsub.f32 %v399_v2, %v557_v39  ;;  %v584_v43 = vmul.f32 1.442695, %v576_v41 }
 0x3f7   :  { %v586_v44 = vmul.f32 1.442695, %v577_v42  ;;  %1470 = vpow2.f32 %v584_v43 }
 0x3f9   :  { %1472 = vpow2.f32 %v586_v44 }
 0x401   :  { %v1471_v45 = vpop.eup %1470 }
 0x402   :  { %v600_v47 = vsel %vm279_vm3, %v1471_v45, 0.0 }
 0x403   :  { %v1473_v46 = vpop.eup %1472 }
 0x404   :  { %v603_v51 = vsel %vm279_vm3, %v1473_v46, 0.0 }
 0x40c   :  { %601 = vadd.xlane.f32.xlu0 %v600_v47 }
 0x40e   :  { %604 = vadd.xlane.f32.xlu1 %v603_v51 }
 0x45c   :  { %v560_v60 = vpop.xlane.xlu0 %559 }
 0x45d   :  { %v578_v63 = vsub.f32 %v446_v10, %v560_v60 }
 0x45e   :  { %v563_v36 = vpop.xlane.xlu1 %562 }
 0x45f   :  { %v579_v40 = vsub.f32 %v449_v16, %v563_v36  ;;  %v588_v49 = vmul.f32 1.442695, %v578_v63 }
 0x460   :  { %v566_v38 = vpop.xlane.xlu0 %565 }
 0x461   :  { %v580_v48 = vsub.f32 %v496_v20, %v566_v38  ;;  %v590_v56 = vmul.f32 1.442695, %v579_v40 }
 0x462   :  { %v569_v50 = vpop.xlane.xlu1 %568 }
 0x463   :  { %v592_v52 = vmul.f32 1.442695, %v580_v48  ;;  %v581_v54 = vsub.f32 %v499_v24, %v569_v50  ;;  %v1443_v50 = vld [vmem:[%s1964_s6 + $0x8] sm:$0xff]  }
 0x464   :  { %v572_v55 = vpop.xlane.xlu0 %571 }
 0x465   :  { %1474 = vpow2.f32 %v592_v52  ;;  %v594_v57 = vmul.f32 1.442695, %v581_v54  ;;  %v582_v58 = vsub.f32 %v546_v28, %v572_v55 }
 0x466   :  { %1476 = vpow2.f32 %v588_v49  ;;  %v575_v61 = vpop.xlane.xlu1 %574  ;;  %v1442_v49 = vld [vmem:[%s1964_s6] sm:$0xff]  }
 0x467   :  { %1478 = vpow2.f32 %v594_v57  ;;  %v596_v62 = vmul.f32 1.442695, %v582_v58  ;;  %v583_v2 = vsub.f32 %v549_v32, %v575_v61 }
 0x468   :  { %v650_v4 = vpop.permute.xlu0 %649  ;;  %1480 = vpow2.f32 %v590_v56 }
 0x469   :  { %v598_v6 = vmul.f32 1.442695, %v583_v2  ;;  %1344 = vmatpush3.bf16.msra.mxu0 %v650_v4  ;;  %1482 = vpow2.f32 %v596_v62  ;;  %v1445_v62 = vld [vmem:[%s1964_s6 + $0x18] sm:$0xff]  }
 0x46a   :  { %v698_v7 = vpop.permute.xlu1 %697  ;;  %1355 = vmatprep.subr.bf16.mxu0 %v1539_v12 }
 0x46b   :  { %1350 = vmatpush3.bf16.msra.mxu1 %v698_v7  ;;  %1484 = vpow2.f32 %v598_v6 }
 0x46c   :  { %1361 = vmatprep.subr.bf16.mxu1 %v1539_v12 }
 0x46f   :  { %v1475_v8 = vpop.eup %1474 }
 0x470   :  { %v1477_v10 = vpop.eup %1476  ;;  %v612_v13 = vsel %vm279_vm3, %v1475_v8, 0.0 }
 0x471   :  { %v1479_v15 = vpop.eup %1478  ;;  %613 = vadd.xlane.f32.xlu0 %v612_v13  ;;  %v606_v18 = vsel %vm279_vm3, %v1477_v10, 0.0 }
 0x472   :  { %v615_v16 = vsel %vm279_vm3, %v1479_v15, 0.0  ;;  %v1481_v17 = vpop.eup %1480 }
 0x473   :  { %616 = vadd.xlane.f32.xlu1 %v615_v16  ;;  %v1483_v19 = vpop.eup %1482  ;;  %v609_v20 = vsel %vm279_vm3, %v1481_v17, 0.0 }
 0x474   :  { %v618_v22 = vsel %vm279_vm3, %v1483_v19, 0.0 }
 0x475   :  { %607 = vadd.xlane.f32.xlu0 %v606_v18  ;;  %v1485_v21 = vpop.eup %1484 }
 0x476   :  { %v621_v23 = vsel %vm279_vm3, %v1485_v21, 0.0 }
 0x477   :  { %610 = vadd.xlane.f32.xlu1 %v609_v20 }
 0x479   :  { %619 = vadd.xlane.f32.xlu0 %v618_v22 }
 0x47b   :  { %622 = vadd.xlane.f32.xlu1 %v621_v23 }
 0x48c   :  { %745 = vrot.lane.b32.xlu1 %v646_v5, %s1546_s1 }
 0x48f   :  { %793 = vrot.lane.b32.xlu0 %v647_v14, %s1546_s1 }
 0x499   :  { %v602_v24 = vpop.xlane.xlu0 %601 }
 0x49a   :  { %1486 = vrcp.f32 %v602_v24 }
 0x49b   :  { %v605_v25 = vpop.xlane.xlu1 %604 }
 0x49c   :  { %1488 = vrcp.f32 %v605_v25 }
 0x4a4   :  { %v1487_v26 = vpop.eup %1486 }
 0x4a5   :  { %v632_v28 = vmul.f32 %v1487_v26, %v1471_v45 }
 0x4a6   :  { %v1489_v27 = vpop.eup %1488 }
 0x4a7   :  { %v633_v29 = vmul.f32 %v1489_v27, %v1473_v46 }
 0x4a9   :  { %v640_v30 = vpack.c.bf16 %v633_v29, %v632_v28 }
 0x4ab   :  { %1346 = vmatmul.mubr.msk.bf16.vlgmr.msra.gmra.mrb[8].mxu0 %vm279_vm3, %v640_v30 }
 0x4ac   :  { %1357 = vmatprep.mubr.msk.bf16.mxu0 %vm1540_vm1, %v1539_v12 }
 0x4fe   :  { %v614_v53 = vpop.xlane.xlu0 %613 }
 0x4ff   :  { %1490 = vrcp.f32 %v614_v53 }
 0x500   :  { %v617_v3 = vpop.xlane.xlu1 %616 }
 0x501   :  { %1492 = vrcp.f32 %v617_v3  ;;  %v1247_v3 = vld [vmem:[%s1965_s7] ss:$0 sm:$0xff] }
 0x502   :  { %v608_v59 = vpop.xlane.xlu0 %607 }
 0x503   :  { %1494 = vrcp.f32 %v608_v59 }
 0x504   :  { %v611_v5 = vpop.xlane.xlu1 %610 }
 0x505   :  { %1496 = vrcp.f32 %v611_v5 }
 0x506   :  { %v620_v9 = vpop.xlane.xlu0 %619 }
 0x508   :  { %v623_v14 = vpop.xlane.xlu1 %622 }
 0x509   :  { %v1491_v31 = vpop.eup %1490  ;;  %1498 = vrcp.f32 %v623_v14 }
 0x50a   :  { %1500 = vrcp.f32 %v620_v9  ;;  %v636_v33 = vmul.f32 %v1491_v31, %v1475_v8  ;;  %v794_v46 = vpop.permute.xlu0 %793 }
 0x50b   :  { %v1493_v32 = vpop.eup %1492 }
 0x50c   :  { %v637_v34 = vmul.f32 %v1493_v32, %v1479_v15  ;;  %v746_v35 = vpop.permute.xlu1 %745 }
 0x50d   :  { %v1495_v37 = vpop.eup %1494  ;;  %1356 = vmatpush3.bf16.msra.mxu0 %v746_v35 }
 0x50e   :  { %v642_v39 = vpack.c.bf16 %v637_v34, %v636_v33  ;;  %1367 = vmatprep.subr.bf16.mxu0 %v1539_v12  ;;  %v634_v42 = vmul.f32 %v1495_v37, %v1477_v10 }
 0x50f   :  { %v1497_v41 = vpop.eup %1496 }
 0x510   :  { %v635_v43 = vmul.f32 %v1497_v41, %v1481_v17  ;;  %1358 = vmatmul.mubr.msk.bf16.vlgmr.msra.gmra.mrb[12].mxu0 %vm279_vm3, %v642_v39 }
 0x511   :  { %1375 = vmatprep.mubr.msk.bf16.mxu0 %vm1540_vm1, %v1539_v12  ;;  %1368 = vmatpush3.bf16.msra.mxu0 %v1442_v49 }
 0x512   :  { %v641_v44 = vpack.c.bf16 %v635_v43, %v634_v42  ;;  %1369 = vmatprep.subr.bf16.mxu0 %v1539_v12  ;;  %v1451_v42 = vld [vmem:[%s1967_s9 + $0x14] ss:$8 sps:$4 sm:$0xff]   ;;  %v1449_v43 = vld [vmem:[%s1967_s9 + $0x10] ss:$8 sps:$4 sm:$0xff]  }
 0x513   :  { %v1499_v45 = vpop.eup %1498 }
 0x514   :  { %1352 = vmatmul.mubr.msk.bf16.vlgmr.msra.gmra.mrb[16].mxu1 %vm279_vm3, %v641_v44  ;;  %v1501_v47 = vpop.eup %1500  ;;  %v639_v51 = vmul.f32 %v1499_v45, %v1485_v21  ;;  %v1454_v44 = vld [vmem:[%s1967_s9 + $0x24] ss:$8 sps:$4 sm:$0xff]   ;;  %v1452_v45 = vld [vmem:[%s1967_s9 + $0x20] ss:$8 sps:$4 sm:$0xff]  }
 0x515   :  { %1362 = vmatpush3.bf16.msra.mxu1 %v794_v46  ;;  %1363 = vmatprep.mubr.msk.bf16.mxu1 %vm1540_vm1, %v1539_v12  ;;  %v638_v60 = vmul.f32 %v1501_v47, %v1483_v19  ;;  %v1457_v46 = vld [vmem:[%s1967_s9 + $0x34] ss:$8 sps:$4 sm:$0xff]   ;;  %v1455_v47 = vld [vmem:[%s1967_s9 + $0x30] ss:$8 sps:$4 sm:$0xff]  }
 0x516   :  { %1370 = vmatpush3.bf16.msra.mxu0 %v1443_v50 }
 0x517   :  { %v643_v63 = vpack.c.bf16 %v639_v51, %v638_v60  ;;  %1371 = vmatprep.subr.bf16.mxu0 %v1539_v12 }
 0x51c   :  { %1364 = vmatmul.mubr.msk.bf16.vlgmr.msra.gmra.mrb[20].mxu1 %vm279_vm3, %v643_v63 }
 0x51d   :  { %1066 = vmatprep.mubr.bf16.mxu1 %v1538_v11  ;;  %v1444_v11 = vld [vmem:[%s1964_s6 + $0x10] sm:$0xff]  }
 0x51e   :  { %1372 = vmatpush3.bf16.msra.mxu0 %v1444_v11  ;;  %v1253_v11 = vld [vmem:[%s1966_s8] ss:$0 sm:$0xff] }
 0x51f   :  { %1373 = vmatprep.subr.bf16.mxu0 %v1539_v12 }
 0x522   :  { %1374 = vmatpush3.bf16.msra.mxu0 %v1445_v62  ;;  %v1461_v62 = vld [vmem:[%s1968_s10 + $0x18] sm:$0xff]  }
 0x523   :  { %1379 = vmatprep.subr.bf16.mxu0 %v1539_v12 }
 0x57e   :  { %v689_v36 = vpop.f32.mrb[8].mxu0 }
 0x57f   :  { %v1347_v38 = vpop.f32.mrb[9].mxu0 }
 0x580   :  { %v692_v40 = vpop.f32.mrb[10].mxu0 }
 0x581   :  { %v1348_v48 = vpop.f32.mrb[11].mxu0 }
 0x5e3   :  { %v785_v52 = vpop.f32.mrb[12].mxu0 }
 0x5e4   :  { %v1359_v54 = vpop.f32.mrb[13].mxu0 }
 0x5e5   :  { %v788_v55 = vpop.f32.mrb[14].mxu0 }
 0x5e6   :  { %v1411_v56 = vpack.i.bf16 %v788_v55, %v785_v52  ;;  %v1360_v57 = vpop.f32.mrb[15].mxu0 }
 0x5e7   :  { %v737_v58 = vpop.f32.mrb[16].mxu1  ;;  %v1458_v57 = vld [vmem:[%s1968_s10] sm:$0xff]  }
 0x5e8   :  { %1412 = vrot.lane.b32.xlu0 %v1411_v56, %s1541_s24  ;;  %v1353_v61 = vpop.f32.mrb[17].mxu1 }
 0x5e9   :  { %v740_v2 = vpop.f32.mrb[18].mxu1  ;;  %v1460_v61 = vld [vmem:[%s1968_s10 + $0x10] sm:$0xff]  }
 0x5ea   :  { %v1416_v4 = vpack.i.bf16 %v740_v2, %v737_v58  ;;  %v1354_v6 = vpop.f32.mrb[19].mxu1  ;;  %v1459_v58 = vld [vmem:[%s1968_s10 + $0x8] sm:$0xff]   ;;  %v1462_v2 = vld [vmem:[%s1968_s10 + $0x20] sm:$0xff]  }
 0x5eb   :  { %v1464_v6 = vld [vmem:[%s1968_s10 + $0x30] sm:$0xff]  }
 0x5ec   :  { %1417 = vrot.lane.b32.xlu1 %v1416_v4, %s1544_s17  ;;  %v1463_v4 = vld [vmem:[%s1968_s10 + $0x28] sm:$0xff]  }
 0x5ef   :  { %v833_v7 = vpop.f32.mrb[20].mxu1 }
 0x5f0   :  { %v1365_v8 = vpop.f32.mrb[21].mxu1 }
 0x5f1   :  { %v836_v10 = vpop.f32.mrb[22].mxu1 }
 0x5f2   :  { %v1421_v13 = vpack.i.bf16 %v836_v10, %v833_v7  ;;  %v1366_v15 = vpop.f32.mrb[23].mxu1  ;;  %v1465_v7 = vld [vmem:[%s1968_s10 + $0x38] sm:$0xff]  }
 0x5f4   :  { %1422 = vrot.lane.b32.xlu1 %v1421_v13, %s1542_s16 }
 0x65a   :  { %v1413_v19 = vpop.permute.xlu0 %1412 }
 0x65b   :  { %v1415_v22 = vunpack.i.h.bf16 %v1413_v19  ;;  %v1414_v23 = vunpack.i.l.bf16 %v1413_v19 }
 0x65e   :  { %v1418_v16 = vpop.permute.xlu1 %1417 }
 0x65f   :  { %v1420_v17 = vunpack.i.h.bf16 %v1418_v16  ;;  %v1419_v18 = vunpack.i.l.bf16 %v1418_v16 }
 0x661   :  { %v865_v20 = vsel %vm279_vm3, %v692_v40, %v1420_v17  ;;  %v864_v21 = vsel %vm279_vm3, %v689_v36, %v1419_v18 }
 0x662   :  { %v867_v27 = vsel %vm866_vm4, %v864_v21, %v1414_v23  ;;  %v868_v28 = vsel %vm866_vm4, %v865_v20, %v1415_v22 }
 0x666   :  { %v1423_v24 = vpop.permute.xlu1 %1422 }
 0x667   :  { %v1425_v25 = vunpack.i.h.bf16 %v1423_v24  ;;  %v1424_v26 = vunpack.i.l.bf16 %v1423_v24 }
 0x669   :  { %v870_v29 = vsel %vm258_vm2, %v868_v28, %v1425_v25  ;;  %v869_v30 = vsel %vm258_vm2, %v867_v27, %v1424_v26 }
 0x66a   :  { %v871_v53 = vpack.c.bf16 %v870_v29, %v869_v30  ;;  %v1263_v30 = vld [vmem:[%s1969_s11] ss:$0 sm:$0xff] }
 0x66c   :  { %1376 = vmatmul.mubr.msk.bf16.vlgmr.msra.gmra.mrb[16].mxu0 %vm54_vm0, %v871_v53 }
 0x66d   :  { %1395 = vmatprep.mubr.msk.bf16.mxu0 %vm1540_vm1, %v1539_v12  ;;  %1380 = vmatpush3.bf16.msra.mxu0 %v1458_v57 }
 0x66e   :  { %1381 = vmatprep.subr.bf16.mxu0 %v1539_v12 }
 0x671   :  { %1382 = vmatpush3.bf16.msra.mxu0 %v1459_v58 }
 0x672   :  { %1383 = vmatprep.subr.bf16.mxu0 %v1539_v12 }
 0x675   :  { %1384 = vmatpush3.bf16.msra.mxu0 %v1460_v61 }
 0x676   :  { %1385 = vmatprep.subr.bf16.mxu0 %v1539_v12 }
 0x679   :  { %1386 = vmatpush3.bf16.msra.mxu0 %v1461_v62 }
 0x67a   :  { %1387 = vmatprep.subr.bf16.mxu0 %v1539_v12 }
 0x67d   :  { %1388 = vmatpush3.bf16.msra.mxu0 %v1462_v2 }
 0x67e   :  { %1389 = vmatprep.subr.bf16.mxu0 %v1539_v12 }
 0x681   :  { %1390 = vmatpush3.bf16.msra.mxu0 %v1463_v4 }
 0x682   :  { %1391 = vmatprep.subr.bf16.mxu0 %v1539_v12 }
 0x685   :  { %1392 = vmatpush3.bf16.msra.mxu0 %v1464_v6 }
 0x686   :  { %1393 = vmatprep.subr.bf16.mxu0 %v1539_v12 }
 0x689   :  { %1394 = vmatpush3.bf16.msra.mxu0 %v1465_v7 }
 0x73f   :  { %v948_v59 = vpop.f32.mrb[16].mxu0 }
 0x740   :  { %v949_v5 = vadd.f32 %v1247_v3, %v948_v59  ;;  %v1377_v9 = vpop.f32.mrb[17].mxu0 }
 0x741   :  { %v951_v14 = vpop.f32.mrb[18].mxu0 }
 0x742   :  { %v1867_v31 = vadd.f32 %v949_v5, %v1618_v0  ;;  %v952_v32 = vadd.f32 %v1247_v3, %v951_v14  ;;  %v1378_v33 = vpop.f32.mrb[19].mxu0  ;;  %v1448_v0 = vld [vmem:[%s1967_s9 + $0x4] ss:$8 sps:$4 sm:$0xff]  }
 0x743   :  { %1034 = vmatprep.subr.bf16.mxu1 %v1448_v0 }
 0x744   :  { %v1870_v34 = vadd.f32 %v952_v32, %v1623_v1  ;;  %v958_v35 = vmul.f32 %v1867_v31, %v1867_v31  ;;  %v1446_v1 = vld [vmem:[%s1967_s9] ss:$8 sps:$4 sm:$0xff]  }
 0x745   :  { %1035 = vmatpush1.bf16.msra.mxu1 %v1446_v1 }
 0x746   :  { %v960_v37 = vsel %vm54_vm0, %v958_v35, 0.0  ;;  %v959_v39 = vmul.f32 %v1870_v34, %v1870_v34  ;;  %1036 = vmatprep.subr.bf16.mxu1 %v1451_v42 }
 0x747   :  { %961 = vadd.xlane.f32.xlu0 %v960_v37 }
 0x748   :  { %v963_v41 = vsel %vm54_vm0, %v959_v39, 0.0 }
 0x749   :  { %964 = vadd.xlane.f32.xlu1 %v963_v41  ;;  %1037 = vmatpush1.bf16.msra.mxu1 %v1449_v43 }
 0x74a   :  { %1038 = vmatprep.subr.bf16.mxu1 %v1454_v44 }
 0x74d   :  { %1039 = vmatpush1.bf16.msra.mxu1 %v1452_v45 }
 0x74e   :  { %1040 = vmatprep.subr.bf16.mxu1 %v1457_v46 }
 0x751   :  { %1041 = vmatpush1.bf16.msra.mxu1 %v1455_v47 }
 0x7d4   :  { %v962_v51 = vpop.xlane.xlu0 %961 }
 0x7d5   :  { %v966_v60 = vmul.f32 0.015625, %v962_v51 }
 0x7d6   :  { %v965_v63 = vpop.xlane.xlu1 %964 }
 0x7d7   :  { %v968_v36 = vadd.f32 1e-06, %v966_v60  ;;  %v967_v38 = vmul.f32 0.015625, %v965_v63 }
 0x7d9   :  { %1502 = vrsqrt.f32 %v968_v36  ;;  %v969_v40 = vadd.f32 1e-06, %v967_v38 }
 0x7db   :  { %1504 = vrsqrt.f32 %v969_v40 }
 0x7e3   :  { %v1503_v48 = vpop.eup %1502 }
 0x7e4   :  { %v972_v49 = vmul.f32 %v1503_v48, %v1867_v31 }
 0x7e5   :  { %v1505_v50 = vpop.eup %1504 }
 0x7e6   :  { %v973_v52 = vmul.f32 %v1505_v50, %v1870_v34  ;;  %v980_v54 = vmul.f32 %v1253_v11, %v972_v49 }
 0x7e8   :  { %v981_v55 = vmul.f32 %v1253_v11, %v973_v52 }
 0x7ea   :  { %v982_v56 = vpack.c.bf16 %v981_v55, %v980_v54 }
 0x7ec   :  { %1262 = vmatmul.mubr.msk.bf16.vlgmr.msra.gmra.mrb[24].mxu1 %vm54_vm0, %v982_v56 }
 0x8bf   :  { %v1068_v8 = vpop.f32.mrb[24].mxu1 }
 0x8c0   :  { %v1077_v10 = vsub.f32 0.0, %v1068_v8  ;;  %v1070_v13 = vpop.f32.mrb[25].mxu1 }
 0x8c1   :  { %v1072_v15 = vpop.f32.mrb[26].mxu1 }
 0x8c2   :  { %v1079_v16 = vmul.f32 1.442695, %v1077_v10  ;;  %v1078_v17 = vsub.f32 0.0, %v1072_v15  ;;  %v1074_v18 = vpop.f32.mrb[27].mxu1 }
 0x8c4   :  { %1506 = vpow2.f32 %v1079_v16  ;;  %v1081_v19 = vmul.f32 1.442695, %v1078_v17 }
 0x8c6   :  { %1508 = vpow2.f32 %v1081_v19 }
 0x8ce   :  { %v1507_v20 = vpop.eup %1506 }
 0x8cf   :  { %v1083_v21 = vadd.f32 1.0, %v1507_v20 }
 0x8d0   :  { %v1509_v22 = vpop.eup %1508 }
 0x8d1   :  { %1510 = vrcp.f32 %v1083_v21  ;;  %v1084_v12 = vadd.f32 1.0, %v1509_v22 }
 0x8d3   :  { %1512 = vrcp.f32 %v1084_v12 }
 0x8db   :  { %v1511_v23 = vpop.eup %1510 }
 0x8dc   :  { %v1087_v24 = vmul.f32 %v1511_v23, %v1068_v8 }
 0x8dd   :  { %v1513_v25 = vpop.eup %1512 }
 0x8de   :  { %v1089_v26 = vmul.f32 %v1087_v24, %v1070_v13  ;;  %v1088_v27 = vmul.f32 %v1513_v25, %v1072_v15 }
 0x8e0   :  { %v1090_v28 = vmul.f32 %v1088_v27, %v1074_v18 }
 0x8e2   :  { %v1091_v29 = vpack.c.bf16 %v1090_v28, %v1089_v26 }
 0x8e4   :  { %1396 = vmatmul.mubr.bf16.vlgmr.msra.gmra.mrb[20].mxu0 %v1091_v29 }
 0x9b7   :  { %v1197_v53 = vpop.f32.mrb[20].mxu0 }
 0x9b8   :  { %v1198_v3 = vadd.f32 %v1263_v30, %v1197_v53  ;;  %v1397_v59 = vpop.f32.mrb[21].mxu0 }
 0x9b9   :  { %v1200_v5 = vpop.f32.mrb[22].mxu0 }
 0x9ba   :  { %v1204_v9 = vadd.f32 %v1198_v3, %v1867_v31  ;;  %v1201_v14 = vadd.f32 %v1263_v30, %v1200_v5  ;;  %v1398_v32 = vpop.f32.mrb[23].mxu0 }
 0x9bc   :  { %1206 = vst.msk [vmem:[#allocation2] sm:$0xff] %vm54_vm0, %v1204_v9  ;;  %v1205_v33 = vadd.f32 %v1201_v14, %v1870_v34 }
 0x9be   :  { %1207 = vst.msk [vmem:[#allocation2 + $0x8] sm:$0xff] %vm54_vm0, %v1205_v33 }
 0x9bf   :  { %1525 = shalt.err (!%p1522_p4)
}
 0x9c0   :  { %s1526_s22 = scalar_lea.hbm %s1970_s12, 256 }
 0x9c1   :  { %p1527_p5 = scmp.ne.s32.totalorder %s1970_s12, %s1526_s22  ;;  %p1530_p6 = scmp.lt.u32.totalorder %s1526_s22, %s1970_s12 }
 0x9c3   :  { %p1532_p7 = pnand %p1530_p6, %p1527_p5 }
 0x9c5   :  { %1535 = shalt.err (!%p1532_p7)
}
 0x9c6   :  { %s1548_s27 = smov 128   ;;  %s1549_s0 = smov 8  }
 0x9c7   :  { %1219 = dma.vmem_to_hbm [thread:$0]  %s1214_s20, 256, %s1970_s12, [#allocation3], %s1548_s27, %s1548_s27, %s1549_s0  }
 0x9c8   :  { %1536 = dma.done.wait [#allocation3], 256  }
 0x9c9   :  { %1537 = vsyncadd [#allocation3], 4294967040 }
 0x9ca   :  { %1223 = vsyncpa [#allocation3], 1 }

</bundles_post_ra>
